<compile_context>
chip_gen: v6e
topology: v6e:2x2x1
jax: 0.10.0
libtpu: 0.0.40
codegen_flags: <defaults>
</compile_context>

<pallas_src>
import functools

import jax
import jax.numpy as jnp
from jax import lax
from jax.experimental import pallas as pl
from jax.experimental.pallas import tpu as pltpu


def _round_up(x, m):
    return ((x + m - 1) // m) * m


# ----------------------------------------------------------------------------
# Kernel 1: FeatureReducer  ->  relu(x @ W + b), row-tiled
# ----------------------------------------------------------------------------
def _linear_relu_kernel(x_ref, w_ref, b_ref, o_ref):
    y = jnp.dot(x_ref[...], w_ref[...], preferred_element_type=jnp.float32)
    o_ref[...] = jnp.maximum(y + b_ref[...], 0.0)


def feature_reducer(x, w, b, *, block_rows=512):
    """x: [M, K] f32, w: [K, D] f32, b: [1, D] f32 -> relu(x @ w + b): [M, D]."""
    M, K = x.shape
    D = w.shape[1]
    tm = min(block_rows, _round_up(M, 8))
    M_pad = _round_up(M, tm)
    if M_pad != M:
        x = jnp.pad(x, ((0, M_pad - M), (0, 0)))

    out = pl.pallas_call(
        _linear_relu_kernel,
        out_shape=jax.ShapeDtypeStruct((M_pad, D), jnp.float32),
        grid=(M_pad // tm,),
        in_specs=[
            pl.BlockSpec((tm, K), lambda i: (i, 0)),    # row tile of x
            pl.BlockSpec((K, D), lambda i: (0, 0)),     # W resident
            pl.BlockSpec((1, D), lambda i: (0, 0)),     # b resident
        ],
        out_specs=pl.BlockSpec((tm, D), lambda i: (i, 0)),
        compiler_params=pltpu.CompilerParams(
            dimension_semantics=("parallel",)),
    )(x, w, b)
    return out[:M] if M_pad != M else out


# ----------------------------------------------------------------------------
# Kernel 2: fused edge FeatureReducer + EdgeLabelPredictor, row-tiled over edges
#
#   per edge tile:
#     n_src = onehot(src) @ n        (in-kernel gather, n resident in VMEM)
#     n_dst = onehot(dst) @ n
#     e_red = relu(ef @ We_red + be_red)               (only if edge features)
#     score = sum( (n_src @ Wm) * n_dst
#                  + n_src * cu + n_dst * cv
#                  [+ e_red * we_row], -1) + bias_const
#   where Wm = Wu Wv^T, cu = Wu bv, cv = Wv bu, bias_const = bu·bv [+ be_dot]
#   (exact algebraic folding of the original u·v dot product).
# ----------------------------------------------------------------------------
def _edge_scorer_kernel(include_edge_features, *refs):
    if include_edge_features:
        (src_ref, dst_ref, ef_ref, n_ref, wer_ref, ber_ref,
         wm_ref, cu_ref, cv_ref, wed_ref, bias_ref, o_ref) = refs
    else:
        (src_ref, dst_ref, n_ref,
         wm_ref, cu_ref, cv_ref, bias_ref, o_ref) = refs

    tm = src_ref.shape[0]
    n_nodes = n_ref.shape[0]

    # in-kernel gather of reduced node embeddings via one-hot matmul
    node_iota = lax.broadcasted_iota(jnp.int32, (tm, n_nodes), 1)
    src_oh = (src_ref[...] == node_iota).astype(jnp.float32)        # [TM, N]
    dst_oh = (dst_ref[...] == node_iota).astype(jnp.float32)        # [TM, N]
    n_src = jnp.dot(src_oh, n_ref[...], preferred_element_type=jnp.float32)
    n_dst = jnp.dot(dst_oh, n_ref[...], preferred_element_type=jnp.float32)

    # folded dot-product score
    src_m = jnp.dot(n_src, wm_ref[...], preferred_element_type=jnp.float32)
    combined = src_m * n_dst + n_src * cu_ref[...] + n_dst * cv_ref[...]

    if include_edge_features:
        # fused edge FeatureReducer + VPU reduce (no width-1 MXU matmul)
        e_red = jnp.maximum(
            jnp.dot(ef_ref[...], wer_ref[...],
                    preferred_element_type=jnp.float32) + ber_ref[...], 0.0)
        combined = combined + e_red * wed_ref[...]

    o_ref[...] = jnp.sum(combined, axis=-1, keepdims=True) + bias_ref[...]


def edge_scorer(n, edge_features, src_ids, dst_ids, params,
                include_edge_features=True, *, block_rows=512):
    E = src_ids.shape[0]
    N, D = n.shape
    K = edge_features.shape[1]

    tm = min(block_rows, _round_up(E, 8))
    E_pad = _round_up(E, tm)

    src = src_ids.astype(jnp.int32).reshape(E, 1)
    dst = dst_ids.astype(jnp.int32).reshape(E, 1)
    ef = edge_features
    if E_pad != E:
        pad = E_pad - E
        src = jnp.pad(src, ((0, pad), (0, 0)))   # padded ids -> node 0 (sliced off)
        dst = jnp.pad(dst, ((0, pad), (0, 0)))
        ef = jnp.pad(ef, ((0, pad), (0, 0)))

    # one-time folded weights (tiny O(D*P) work in the wrapper)
    wu, wv = params["wu"], params["wv"]          # [D, P]
    bu, bv = params["bu"], params["bv"]          # [1, P]
    wm = wu @ wv.T                               # [D, D]
    cu = (wu @ bv[0])[None, :]                   # [1, D]
    cv = (wv @ bu[0])[None, :]                   # [1, D]
    bias = jnp.sum(bu * bv)                      # scalar
    if include_edge_features:
        wed = params["we_dot"].T                 # [1, D]
        bias = bias + params["be_dot"][0, 0]
    bias = bias.reshape(1, 1)

    tile = lambda i: (i, 0)
    resident = lambda i: (0, 0)

    if include_edge_features:
        in_specs = [
            pl.BlockSpec((tm, 1), tile),        # src ids
            pl.BlockSpec((tm, 1), tile),        # dst ids
            pl.BlockSpec((tm, K), tile),        # raw edge features
            pl.BlockSpec((N, D), resident),     # reduced node table (resident)
            pl.BlockSpec((K, D), resident),     # edge reducer W
            pl.BlockSpec((1, D), resident),     # edge reducer b
            pl.BlockSpec((D, D), resident),     # Wm
            pl.BlockSpec((1, D), resident),     # cu
            pl.BlockSpec((1, D), resident),     # cv
            pl.BlockSpec((1, D), resident),     # we_dot row
            pl.BlockSpec((1, 1), resident),     # folded bias
        ]
        args = (src, dst, ef, n, params["we_red"], params["be_red"],
                wm, cu, cv, wed, bias)
    else:
        in_specs = [
            pl.BlockSpec((tm, 1), tile),
            pl.BlockSpec((tm, 1), tile),
            pl.BlockSpec((N, D), resident),
            pl.BlockSpec((D, D), resident),
            pl.BlockSpec((1, D), resident),
            pl.BlockSpec((1, D), resident),
            pl.BlockSpec((1, 1), resident),
        ]
        args = (src, dst, n, wm, cu, cv, bias)

    out = pl.pallas_call(
        functools.partial(_edge_scorer_kernel, include_edge_features),
        out_shape=jax.ShapeDtypeStruct((E_pad, 1), jnp.float32),
        grid=(E_pad // tm,),
        in_specs=in_specs,
        out_specs=pl.BlockSpec((tm, 1), tile),
        compiler_params=pltpu.CompilerParams(
            dimension_semantics=("parallel",)),
    )(*args)
    return out[:E] if E_pad != E else out


# ----------------------------------------------------------------------------
# Full model forward
# ----------------------------------------------------------------------------
def model_forward(params, node_features, edge_features, src_ids, dst_ids,
                  include_edge_features=True):
    n = feature_reducer(node_features, params["wn"], params["bn"])   # [N, D]
    h = edge_scorer(n, edge_features, src_ids, dst_ids, params,
                    include_edge_features=include_edge_features)     # [E, 1]
    return h


# ----------------------------------------------------------------------------
# Pure-JAX reference of the original module (for correctness check)
# ----------------------------------------------------------------------------
def model_reference(params, node_features, edge_features, src_ids, dst_ids,
                    include_edge_features=True):
    n = jnp.maximum(node_features @ params["wn"] + params["bn"], 0.0)
    e = jnp.maximum(edge_features @ params["we_red"] + params["be_red"], 0.0)
    n_src = n[src_ids]
    n_dst = n[dst_ids]
    u = n_src @ params["wu"] + params["bu"]
    v = n_dst @ params["wv"] + params["bv"]
    score = jnp.sum(u * v, axis=-1, keepdims=True)
    if include_edge_features:
        score = score + e @ params["we_dot"] + params["be_dot"]
    return score


def init_params(key, node_feature_dim, node_reducer_out, dot_product_dim):
    ks = jax.random.split(key, 10)
    s1 = 1.0 / jnp.sqrt(node_feature_dim)
    s2 = 1.0 / jnp.sqrt(node_reducer_out)
    u = lambda k, shape, s: jax.random.uniform(k, shape, jnp.float32, -s, s)
    return {
        # node FeatureReducer
        "wn": u(ks[0], (node_feature_dim, node_reducer_out), s1),
        "bn": u(ks[1], (1, node_reducer_out), s1),
        # edge FeatureReducer
        "we_red": u(ks[2], (node_feature_dim, node_reducer_out), s1),
        "be_red": u(ks[3], (1, node_reducer_out), s1),
        # EdgeLabelPredictor projections
        "wu": u(ks[4], (node_reducer_out, dot_product_dim), s2),
        "bu": u(ks[5], (1, dot_product_dim), s2),
        "wv": u(ks[6], (node_reducer_out, dot_product_dim), s2),
        "bv": u(ks[7], (1, dot_product_dim), s2),
        # edge-feature linear term -> scalar
        "we_dot": u(ks[8], (node_reducer_out, 1), s2),
        "be_dot": u(ks[9], (1, 1), s2),
    }


if __name__ == "__main__":
    # Small synthetic dyadic graph; E chosen non-multiple of the 512-row tile
    # to exercise the padding + multi-step grid path.
    node_feature_dim = 32
    node_reducer_out = 16
    dot_product_dim = 12
    N, E = 64, 640

    key = jax.random.PRNGKey(0)
    k_nf, k_ef, k_src, k_dst, k_par = jax.random.split(key, 5)

    node_features = jax.random.normal(k_nf, (N, node_feature_dim), jnp.float32)
    edge_features = jax.random.normal(k_ef, (E, node_feature_dim), jnp.float32)
    src_ids = jax.random.randint(k_src, (E,), 0, N)
    dst_ids = jax.random.randint(k_dst, (E,), 0, N)

    params = init_params(k_par, node_feature_dim, node_reducer_out,
                         dot_product_dim)

    ok = True
    for include_edge_features in (True, False):
        h = model_forward(params, node_features, edge_features,
                          src_ids, dst_ids, include_edge_features)
        h = jax.block_until_ready(h)
        ref = model_reference(params, node_features, edge_features,
                              src_ids, dst_ids, include_edge_features)
        assert h.shape == (E, 1) and h.dtype == jnp.float32
        if not bool(jnp.allclose(h, ref, atol=1e-3, rtol=1e-3)):
            ok = False
            print("MISMATCH include_edge_features =", include_edge_features,
                  float(jnp.max(jnp.abs(h - ref))))

    if ok:
        print("KERNEL_OK")
</pallas_src>

<mosaic_0001>
module attributes {stable_mosaic.version = 11 : i64} {
  func.func @_linear_relu_kernel(%arg0: i32, %arg1: memref<64x32xf32, #tpu.memory_space<vmem>>, %arg2: memref<32x16xf32, #tpu.memory_space<vmem>>, %arg3: memref<1x16xf32, #tpu.memory_space<vmem>>, %arg4: memref<64x16xf32, #tpu.memory_space<vmem>>) attributes {dimension_semantics = [#tpu.dimension_semantics<parallel>], iteration_bounds = array<i64: 1>, scalar_prefetch = 0 : i64, scratch_operands = 0 : i64, tpu.core_type = #tpu.core_type<tc>, window_params = [{transform_indices = @transform_0, window_bounds = array<i64: 64, 32>}, {pipeline_mode = #tpu.pipeline_mode<synchronous>, transform_indices = @transform_1, window_bounds = array<i64: 32, 16>}, {pipeline_mode = #tpu.pipeline_mode<synchronous>, transform_indices = @transform_2, window_bounds = array<i64: 1, 16>}, {transform_indices = @transform_3, window_bounds = array<i64: 64, 16>}]} {
    %c0 = arith.constant 0 : index
    %c0_0 = arith.constant 0 : index
    %0 = vector.load %arg1[%c0, %c0_0] : memref<64x32xf32, #tpu.memory_space<vmem>>, vector<64x32xf32>
    %c0_1 = arith.constant 0 : index
    %c0_2 = arith.constant 0 : index
    %1 = vector.load %arg2[%c0_1, %c0_2] : memref<32x16xf32, #tpu.memory_space<vmem>>, vector<32x16xf32>
    %cst = arith.constant dense<0.000000e+00> : vector<64x16xf32>
    %2 = tpu.matmul %0, %1, %cst {dimension_numbers = #tpu.dot_dimension_numbers<[1], [0], [0], [1], [0, 0, 1, 1], [], []>} : vector<64x32xf32>, vector<32x16xf32>, vector<64x16xf32> -> vector<64x16xf32>
    %c0_3 = arith.constant 0 : index
    %c0_4 = arith.constant 0 : index
    %3 = vector.load %arg3[%c0_3, %c0_4] : memref<1x16xf32, #tpu.memory_space<vmem>>, vector<1x16xf32>
    %4 = vector.broadcast %3 : vector<1x16xf32> to vector<64x16xf32>
    %5 = arith.addf %2, %4 : vector<64x16xf32>
    %cst_5 = arith.constant 0.000000e+00 : f32
    %6 = vector.broadcast %cst_5 : f32 to vector<64x16xf32>
    %7 = arith.maximumf %5, %6 : vector<64x16xf32>
    %c0_6 = arith.constant 0 : index
    %c0_7 = arith.constant 0 : index
    %8 = vector.load %arg4[%c0_6, %c0_7] : memref<64x16xf32, #tpu.memory_space<vmem>>, vector<64x16xf32>
    tpu.vector_store %arg4[%c0_6, %c0_7], %7 {strides = array<i32>} : memref<64x16xf32, #tpu.memory_space<vmem>>, vector<64x16xf32>,
    return
  }
  func.func @transform_0(%arg0: i32) -> (i32, i32) {
    %c0_i32 = arith.constant 0 : i32
    %c0_i32_0 = arith.constant 0 : i32
    return %arg0, %c0_i32 : i32, i32
  }
  func.func @transform_1(%arg0: i32) -> (i32, i32) {
    %c0_i32 = arith.constant 0 : i32
    %c0_i32_0 = arith.constant 0 : i32
    %c0_i32_1 = arith.constant 0 : i32
    return %c0_i32, %c0_i32_0 : i32, i32
  }
  func.func @transform_2(%arg0: i32) -> (i32, i32) {
    %c0_i32 = arith.constant 0 : i32
    %c0_i32_0 = arith.constant 0 : i32
    %c0_i32_1 = arith.constant 0 : i32
    return %c0_i32, %c0_i32_0 : i32, i32
  }
  func.func @transform_3(%arg0: i32) -> (i32, i32) {
    %c0_i32 = arith.constant 0 : i32
    %c0_i32_0 = arith.constant 0 : i32
    return %arg0, %c0_i32 : i32, i32
  }
}

</mosaic_0001>

<bundles_post_ra>
// kernel: tpu_custom_call.1
= control target key start
LH: loop header
LB: loop body
LE: loop exit
PB: predicated region body
PF: predicated region fallthrough
CT: control target
= control target key end

     0   :  { %vm33_vm0 = vcmask 261120   ;;  %vm171_vm1 = vcmask 130048   ;;  %s332_s1 = inlined_call_operand.vmem [shape: f32[32,16], index: 1, kind: input, shape index: {}]   ;;  %s333_s0 = inlined_call_operand.vmem [shape: f32[64,32], index: 0, kind: input, shape index: {}]   ;;  %s334_s2 = inlined_call_operand.vmem [shape: f32[1,16], index: 2, kind: input, shape index: {}]   ;;  %s335_s3 = inlined_call_operand.vmem [shape: f32[64,16], index: 3, kind: output, shape index: {}]  }
   0x1   :  { %v25_v0 = vld [vmem:[%s332_s1 + $0x18] sm:$0xff]  ;;  %v24_v1 = vld [vmem:[%s332_s1 + $0x10] sm:$0xff]  ;;  %v23_v2 = vld [vmem:[%s332_s1 + $0x8] sm:$0xff] }
   0x2   :  { %205 = vmatprep.subr.mxu0 %v25_v0  ;;  %225 = vmatprep.subr.mxu1 %v25_v0  ;;  %v22_v3 = vld [vmem:[%s332_s1] sm:$0xff]  ;;  %v15_v6 = vld [vmem:[%s333_s0 + $0x8] sm:$0xff]  ;;  %v16_v8 = vld [vmem:[%s333_s0 + $0x10] sm:$0xff] }
   0x3   :  { %206 = vmatpush3.msra.mxu0 %v25_v0  ;;  %229 = vmatpush3.msra.mxu1 %v25_v0  ;;  %v14_v4 = vld [vmem:[%s333_s0] sm:$0xff]  ;;  %v19_v7 = vld [vmem:[%s333_s0 + $0x28] sm:$0xff]  ;;  %v20_v9 = vld [vmem:[%s333_s0 + $0x30] sm:$0xff] }
   0x4   :  { %207 = vmatprep.subr.mxu0 %v24_v1  ;;  %226 = vmatprep.subr.mxu1 %v24_v1  ;;  %v18_v5 = vld [vmem:[%s333_s0 + $0x20] sm:$0xff]  ;;  %v17_v10 = vld [vmem:[%s333_s0 + $0x18] sm:$0xff] }
   0x5   :  { %208 = vmatpush3.msra.mxu0 %v24_v1  ;;  %230 = vmatpush3.msra.mxu1 %v24_v1  ;;  %v21_v11 = vld [vmem:[%s333_s0 + $0x38] sm:$0xff]  ;;  %v184_v12 = vld [vmem:[%s334_s2] ss:$0 sm:$0xff] }
   0x6   :  { %209 = vmatprep.subr.mxu0 %v23_v2  ;;  %227 = vmatprep.subr.mxu1 %v23_v2 }
   0x7   :  { %210 = vmatpush3.msra.mxu0 %v23_v2  ;;  %231 = vmatpush3.msra.mxu1 %v23_v2 }
   0x8   :  { %211 = vmatprep.subr.mxu0 %v22_v3  ;;  %228 = vmatprep.subr.mxu1 %v22_v3 }
   0x9   :  { %212 = vmatpush3.msra.mxu0 %v22_v3  ;;  %232 = vmatpush3.msra.mxu1 %v22_v3 }
   0xa   :  { %213 = vmatprep.mubr.msk.f32.mxu0 %vm33_vm0, %v14_v4  ;;  %219 = vmatprep.mubr.msk.f32.mxu1 %vm33_vm0, %v18_v5 }
   0xb   :  { %214 = vmatmul.mubr.msk.f32.vlgmr.msra.gmra.mxu0 %vm33_vm0, %v15_v6  ;;  %220 = vmatmul.mubr.msk.f32.vlgmr.msra.gmra.mxu1 %vm33_vm0, %v19_v7 }
   0xc   :  { %216 = vmatprep.mubr.msk.f32.mxu0 %vm33_vm0, %v16_v8  ;;  %222 = vmatprep.mubr.msk.f32.mxu1 %vm33_vm0, %v20_v9 }
   0xf   :  { %217 = vmatmul.mubr.msk.f32.gmra.mxu0 %vm33_vm0, %v17_v10  ;;  %223 = vmatmul.mubr.msk.f32.gmra.mxu1 %vm33_vm0, %v21_v11 }
  0xcb   :  { %v215_v13 = vpop.f32.mrf.mxu0  ;;  %v221_v14 = vpop.f32.mrf.mxu1 }
  0xcc   :  { %v130_v15 = vadd.f32 %v215_v13, %v184_v12  ;;  %v150_v16 = vadd.f32 %v221_v14, %v184_v12 }
  0xcd   :  { %v124_v17 = vpop.f32.mrf.mxu0  ;;  %v144_v18 = vpop.f32.mrf.mxu1 }
  0xce   :  { %v164_v19 = vmax.f32 %v130_v15, 0.0  ;;  %v168_v20 = vmax.f32 %v150_v16, 0.0  ;;  %v125_v21 = vadd.f32 %v184_v12, %v124_v17  ;;  %v145_v22 = vadd.f32 %v184_v12, %v144_v18 }
  0xcf   :  { %v218_v23 = vpop.f32.mrf.mxu0  ;;  %v224_v24 = vpop.f32.mrf.mxu1 }
  0xd0   :  { %173 = vst.msk [vmem:[%s335_s3 + $0x8] sm:$0xff] %vm171_vm1, %v164_v19  ;;  %177 = vst.msk [vmem:[%s335_s3 + $0x28] sm:$0xff] %vm171_vm1, %v168_v20  ;;  %v163_v25 = vmax.f32 %v125_v21, 0.0  ;;  %v167_v26 = vmax.f32 %v145_v22, 0.0  ;;  %v140_v27 = vadd.f32 %v218_v23, %v184_v12  ;;  %v160_v28 = vadd.f32 %v224_v24, %v184_v12 }
  0xd1   :  { %v134_v29 = vpop.f32.mrf.mxu0  ;;  %v154_v30 = vpop.f32.mrf.mxu1 }
  0xd2   :  { %172 = vst.msk [vmem:[%s335_s3] sm:$0xff] %vm171_vm1, %v163_v25  ;;  %176 = vst.msk [vmem:[%s335_s3 + $0x20] sm:$0xff] %vm171_vm1, %v167_v26  ;;  %v166_v31 = vmax.f32 %v140_v27, 0.0  ;;  %v170_v32 = vmax.f32 %v160_v28, 0.0  ;;  %v135_v33 = vadd.f32 %v184_v12, %v134_v29  ;;  %v155_v34 = vadd.f32 %v184_v12, %v154_v30 }
  0xd4   :  { %175 = vst.msk [vmem:[%s335_s3 + $0x18] sm:$0xff] %vm171_vm1, %v166_v31  ;;  %179 = vst.msk [vmem:[%s335_s3 + $0x38] sm:$0xff] %vm171_vm1, %v170_v32  ;;  %v165_v35 = vmax.f32 %v135_v33, 0.0  ;;  %v169_v36 = vmax.f32 %v155_v34, 0.0 }
  0xd6   :  { %174 = vst.msk [vmem:[%s335_s3 + $0x10] sm:$0xff] %vm171_vm1, %v165_v35  ;;  %178 = vst.msk [vmem:[%s335_s3 + $0x30] sm:$0xff] %vm171_vm1, %v169_v36 }

</bundles_post_ra>
